<compile_context>
chip_gen: v7x
topology: tpu7x:2x2x1
jax: 0.10.0
libtpu: 0.0.40
codegen_flags: <defaults>
</compile_context>

<pallas_src>
import math
import jax
import jax.numpy as jnp
from jax.experimental import pallas as pl
from jax.experimental.pallas import tpu as pltpu


# ----------------------------- Pallas kernel ------------------------------ #

def _copy_kernel(x_ref, o_ref):
    # Identity copy of one (tile_rows, 128) tile, VMEM -> VMEM.
    o_ref[...] = x_ref[...]


_LANES = 128
# 4096 rows x 128 lanes x 4 B = 2 MiB per block. in+out double-buffered = 8 MiB,
# which fits every generation's scoped-VMEM default (16 MiB v5e, 32 MiB v6e/v7x).
_MAX_TILE_ROWS = 4096


def _pallas_copy_2d(x2d):
    """Tiled identity copy of a (rows, 128) array (rows need not divide tile)."""
    rows, lanes = x2d.shape
    assert lanes == _LANES
    # Full-extent block if small, otherwise a large aligned tile; the ragged
    # last block is masked by Pallas (grid uses cdiv), no host-side padding.
    tile_rows = rows if rows <= _MAX_TILE_ROWS else _MAX_TILE_ROWS
    grid = (pl.cdiv(rows, tile_rows),)
    nbytes = rows * lanes * x2d.dtype.itemsize
    return pl.pallas_call(
        _copy_kernel,
        out_shape=jax.ShapeDtypeStruct((rows, lanes), x2d.dtype),
        grid_spec=pltpu.PrefetchScalarGridSpec(
            num_scalar_prefetch=0,
            grid=grid,
            in_specs=[pl.BlockSpec((tile_rows, lanes), lambda i: (i, 0))],
            out_specs=pl.BlockSpec((tile_rows, lanes), lambda i: (i, 0)),
        ),
        compiler_params=pltpu.CompilerParams(
            # Independent row-tiles: shard across the 2 TensorCores on v7x.
            dimension_semantics=("parallel",),
        ),
        # Pure-bandwidth custom call: read + write the whole slab once.
        cost_estimate=pl.CostEstimate(
            flops=0, transcendentals=0, bytes_accessed=2 * nbytes
        ),
    )(x2d)


def _materialized_copy(x):
    """Return a fresh buffer with the same contents as `x`, via the Pallas copy."""
    flat = x.reshape(-1)
    n = flat.shape[0]
    itemsize = flat.dtype.itemsize

    if itemsize == 4 and n % _LANES == 0:
        # 32-bit dtype, lane-aligned: copy directly.
        y = _pallas_copy_2d(flat.reshape(-1, _LANES))
        return y.reshape(x.shape)

    if itemsize < 4:
        pack = 4 // itemsize
        if n % (pack * _LANES) == 0:
            # Pack sub-32-bit elements into uint32 lane words (quarters/halves the
            # row count and keeps the (8,128) sublane tile valid for any dtype).
            words = jax.lax.bitcast_convert_type(flat.reshape(-1, pack), jnp.uint32)
            yw = _pallas_copy_2d(words.reshape(-1, _LANES))
            y = jax.lax.bitcast_convert_type(yw.reshape(-1), flat.dtype)
            return y.reshape(x.shape)

    # TODO(synk): ragged (non-128-word-aligned) sizes fall back to a plain XLA
    # copy instead of a slab+tail Pallas split.
    return flat.copy().reshape(x.shape)


# ------------------------------ View module ------------------------------- #

def _resolve_size(size, numel):
    """Replicate torch.Tensor.view size resolution (supports a single -1)."""
    size = tuple(size)
    if size.count(-1) > 1:
        raise ValueError("only one dimension can be inferred")
    if -1 in size:
        known = 1
        for s in size:
            if s != -1:
                known *= s
        if known == 0 or numel % known != 0:
            raise ValueError(f"shape {size} is invalid for input of size {numel}")
        size = tuple(numel // known if s == -1 else s for s in size)
    if math.prod(size) != numel:
        raise ValueError(f"shape {size} is invalid for input of size {numel}")
    return size


class View:
    """JAX/Pallas equivalent of the PyTorch `View(size)` module.

    Default path is zero-copy (a contiguous view is metadata only, exactly like
    torch.Tensor.view on a contiguous tensor).  Pass `materialize=True` to force
    a fresh HBM buffer produced by the Pallas copy kernel.
    """

    def __init__(self, size, materialize=False):
        self.size = tuple(size)
        self.materialize = materialize

    def __call__(self, tensor):
        numel = tensor.size
        target = _resolve_size(self.size, numel)
        # TODO(synk): torch.view raises on non-contiguous inputs; JAX arrays are
        # always logically contiguous here, so this behaves like reshape.
        if self.materialize:
            tensor = _materialized_copy(tensor)
        return tensor.reshape(target)


# --------------------------------- demo ----------------------------------- #

if __name__ == "__main__":
    key = jax.random.PRNGKey(0)
    x = jax.random.normal(key, (2, 4, 16, 16), dtype=jnp.float32)  # NCHW input

    # Fast (metadata-only) path — the common case.
    y_fast = View((2, -1))(x)
    y_fast = jax.block_until_ready(y_fast)

    # Materializing path — exercises the Pallas copy kernel (f32 direct).
    y_mat = View((2, -1), materialize=True)(x)
    y_mat = jax.block_until_ready(y_mat)

    ref = x.reshape(2, -1)
    assert y_fast.shape == (2, 1024) and y_fast.dtype == x.dtype
    assert y_mat.shape == (2, 1024) and y_mat.dtype == x.dtype
    assert bool(jnp.all(y_fast == ref))
    assert bool(jnp.all(y_mat == ref))

    # bf16 path — exercises the uint32 packing branch of the Pallas copy.
    xb = x.astype(jnp.bfloat16)
    yb = View((-1, 64), materialize=True)(xb)
    yb = jax.block_until_ready(yb)
    assert yb.shape == (32, 64) and yb.dtype == jnp.bfloat16
    assert bool(jnp.all(yb == xb.reshape(32, 64)))

    print("KERNEL_OK")
</pallas_src>

<mosaic_0001>
module attributes {stable_mosaic.version = 11 : i64} {
  func.func @_copy_kernel(%arg0: i32, %arg1: memref<16x128xf32, #tpu.memory_space<vmem>>, %arg2: memref<16x128xf32, #tpu.memory_space<vmem>>) attributes {dimension_semantics = [#tpu.dimension_semantics<parallel>], iteration_bounds = array<i64: 1>, scalar_prefetch = 0 : i64, scratch_operands = 0 : i64, tpu.core_type = #tpu.core_type<tc>, window_params = [{transform_indices = @transform_0, window_bounds = array<i64: 16, 128>}, {transform_indices = @transform_1, window_bounds = array<i64: 16, 128>}]} {
    %c0 = arith.constant 0 : index
    %c0_0 = arith.constant 0 : index
    %0 = vector.load %arg1[%c0, %c0_0] : memref<16x128xf32, #tpu.memory_space<vmem>>, vector<16x128xf32>
    %c0_1 = arith.constant 0 : index
    %c0_2 = arith.constant 0 : index
    %1 = vector.load %arg2[%c0_1, %c0_2] : memref<16x128xf32, #tpu.memory_space<vmem>>, vector<16x128xf32>
    tpu.vector_store %arg2[%c0_1, %c0_2], %0 {strides = array<i32>} : memref<16x128xf32, #tpu.memory_space<vmem>>, vector<16x128xf32>,
    return
  }
  func.func @transform_0(%arg0: i32) -> (i32, i32) {
    %c0_i32 = arith.constant 0 : i32
    %c0_i32_0 = arith.constant 0 : i32
    return %arg0, %c0_i32 : i32, i32
  }
  func.func @transform_1(%arg0: i32) -> (i32, i32) {
    %c0_i32 = arith.constant 0 : i32
    %c0_i32_0 = arith.constant 0 : i32
    return %arg0, %c0_i32 : i32, i32
  }
}

</mosaic_0001>

<bundles_post_ra>
// kernel: tpu_custom_call.1
= control target key start
LH: loop header
LB: loop body
LE: loop exit
PB: predicated region body
PF: predicated region fallthrough
CT: control target
= control target key end

     0   :  { %6 = vsyncpa [#allocation3], 0  ;;  %s134_s0 = inlined_call_operand.hbm [shape: f32[16,128], index: 0, kind: input, shape index: {}]   ;;  %s135_s1 = inlined_call_operand.hbm [shape: f32[16,128], index: 1, kind: output, shape index: {}]  }
   0x1   :  { %7 = vsyncpa [#allocation4], 0  ;;  %s96_s6 = smov [#allocation2]   ;;  %s48_s10 = scalar_lea.hbm %s134_s0, 256 }
   0x2   :  { %s13_s7 = sshll.u32 %s96_s6, 4  ;;  %p49_p0 = scmp.ne.s32.totalorder %s134_s0, %s48_s10  ;;  %s14_s7 = int_to_ptr.vmem [resolvable:$true] %s13_s7 }
   0x3   :  { %p52_p1 = scmp.lt.u32.totalorder %s48_s10, %s134_s0 }
   0x5   :  { %p54_p2 = pnand %p52_p1, %p49_p0 }
   0x7   :  { %57 = shalt.err (!%p54_p2)
}
   0x8   :  { %s58_s15 = scalar_lea.vmem %s14_s7, 256  ;;  %p63_p4 = scmp.lt.s32.totalorder %s14_s7, %s14_s7 }
   0x9   :  { %p59_p3 = scmp.ne.s32.totalorder %s14_s7, %s58_s15  ;;  %p64_p5 = scmp.lt.s32.totalorder %s58_s15, %s58_s15 }
   0xb   :  { %p65_p6 = por %p64_p5, %p63_p4 }
   0xd   :  { %p66_p7 = pnand %p65_p6, %p59_p3 }
   0xf   :  { %69 = shalt.err (!%p66_p7)
}
  0x10   :  { %s97_s16 = smov 128   ;;  %s98_s17 = smov 8  }
  0x11   :  { %19 = dma.hbm_to_vmem [thread:$0]  %s134_s0, 256, %s14_s7, [#allocation3], %s97_s16, %s97_s16, %s98_s17  }
  0x12   :  { %92 = dma.done.wait [#allocation3], 256  }
  0x13   :  { %93 = vsyncadd [#allocation3], 4294967040  ;;  %s99_s20 = smov [#allocation5]   ;;  %v23_v0 = vld [vmem:[#allocation2] sm:$0xff]  ;;  %v24_v1 = vld [vmem:[#allocation2 + $0x8] sm:$0xff] }
  0x14   :  { %s32_s21 = sshll.u32 %s99_s20, 4  ;;  %25 = vst [vmem:[#allocation5] sm:$0xff] %v23_v0  ;;  %26 = vst [vmem:[#allocation5 + $0x8] sm:$0xff] %v24_v1  ;;  %s33_s21 = int_to_ptr.vmem [resolvable:$true] %s32_s21 }
  0x15   :  { %s70_s22 = scalar_lea.vmem %s33_s21, 256  ;;  %p75_p9 = scmp.lt.s32.totalorder %s33_s21, %s33_s21 }
  0x16   :  { %p71_p8 = scmp.ne.s32.totalorder %s33_s21, %s70_s22  ;;  %p76_p10 = scmp.lt.s32.totalorder %s70_s22, %s70_s22 }
  0x18   :  { %p77_p11 = por %p76_p10, %p75_p9 }
  0x1a   :  { %p78_p12 = pnand %p77_p11, %p71_p8 }
  0x1c   :  { %81 = shalt.err (!%p78_p12)
}
  0x1d   :  { %s82_s0 = scalar_lea.hbm %s135_s1, 256 }
  0x1e   :  { %p83_p13 = scmp.ne.s32.totalorder %s135_s1, %s82_s0  ;;  %p86_p0 = scmp.lt.u32.totalorder %s82_s0, %s135_s1 }
  0x20   :  { %p88_p1 = pnand %p86_p0, %p83_p13 }
  0x22   :  { %91 = shalt.err (!%p88_p1)
}
  0x23   :  { %38 = dma.vmem_to_hbm [thread:$0]  %s33_s21, 256, %s135_s1, [#allocation4], %s97_s16, %s97_s16, %s98_s17  }
  0x24   :  { %94 = dma.done.wait [#allocation4], 256  }
  0x25   :  { %95 = vsyncadd [#allocation4], 4294967040 }
  0x26   :  { %42 = vsyncpa [#allocation3], 1 }
  0x27   :  { %43 = vsyncpa [#allocation4], 1 }

</bundles_post_ra>
